<compile_context>
chip_gen: v7x
topology: tpu7x:2x2x1
jax: 0.10.0
libtpu: 0.0.40
codegen_flags: <defaults>
</compile_context>

<pallas_src>
import functools

import jax
import jax.numpy as jnp
from jax import lax
from jax.experimental import pallas as pl
from jax.experimental.pallas import tpu as pltpu


# ----------------------------------------------------------------------------
# Tile selection helpers
# ----------------------------------------------------------------------------
def _pick_col_tile(total, candidates=(1024, 512, 256, 128)):
    """Column tile for the weight-streaming matmul (total = 2*D)."""
    for cand in candidates:
        if total % cand == 0:
            return cand
    return total  # small / odd hidden sizes: take the whole thing


def _pick_row_tile(S):
    """Return (tm, S_pad): row tile and (possibly padded) sequence length."""
    for t in (512, 256, 128, 64, 32, 16):
        if S % t == 0:
            return t, S
    if S < 16:
        return S, S  # tiny full-extent tile (test-scale only)
    for t in (256, 128, 64, 32, 16):
        if S >= t:
            return t, ((S + t - 1) // t) * t
    return S, S


# ----------------------------------------------------------------------------
# Kernel 1: adaLN modulation   mod = silu(c) @ W_mod + b_mod
#   act tile: (B, D) bf16, W tile: (D, tn) bf16, bias tile: (1, tn) f32
#   -> out tile (B, tn) f32
# (silu(c) is precomputed once in JAX; it is a tiny (B, D) op, the kernel is bound
#  purely on streaming the (D, 2D) weight.)
# ----------------------------------------------------------------------------
def _mod_linear_kernel(a_ref, w_ref, b_ref, o_ref):
    y = jnp.dot(a_ref[...], w_ref[...],
                preferred_element_type=jnp.float32) + b_ref[...]
    o_ref[...] = y.astype(o_ref.dtype)


# ----------------------------------------------------------------------------
# Kernel 2: fused LayerNorm(no affine) + modulate + final projection.
#   x tile:      (1, tm, D)      bf16
#   shift/scale: (1, 1, D)       f32   (per-batch, broadcast in-kernel)
#   W:           (D, n_pad)      bf16
#   bias:        (1, n_pad)      f32
#   out tile:    (1, tm, n_pad)  bf16
# ----------------------------------------------------------------------------
def _final_layer_kernel(x_ref, sh_ref, sc_ref, w_ref, b_ref, o_ref, *, eps):
    x = x_ref[0].astype(jnp.float32)                         # (tm, D)
    # One-pass statistics: var = E[x^2] - mu^2 (clamped), fewer live f32 temps.
    mu = jnp.mean(x, axis=-1, keepdims=True)                  # (tm, 1)
    var = jnp.maximum(jnp.mean(x * x, axis=-1, keepdims=True) - mu * mu, 0.0)
    # Fused modulate:  (x - mu) * [rsqrt(var+eps) * (1+scale)] + shift
    gain = lax.rsqrt(var + eps) * (1.0 + sc_ref[0])           # (tm, D)
    xm = ((x - mu) * gain + sh_ref[0]).astype(w_ref.dtype)    # bf16 -> MXU
    y = jnp.dot(xm, w_ref[...], preferred_element_type=jnp.float32) + b_ref[...]
    o_ref[0] = y.astype(o_ref.dtype)


# ----------------------------------------------------------------------------
# Wrapper
# ----------------------------------------------------------------------------
def final_layer_forward(params, x, c, *, patch_size, out_channels, eps=1e-6,
                        keep_padded=False):
    """x: (B, S, D), c: (B, D).  Weights stored as (in, out) == torch_weight.T.

    If keep_padded=True, returns (B, S, n_pad) with n_pad = ceil(N/128)*128; the
    consumer (unpatchify) should fuse the [:, :, :N] slice to avoid an extra HBM
    round trip.  keep_padded=False returns the module-exact (B, S, N).
    """
    B, S, D = x.shape
    N = patch_size * patch_size * out_channels

    act_dtype = jnp.bfloat16
    x = x.astype(act_dtype)

    w_mod = params["mod_w"].astype(act_dtype)                 # (D, 2D)
    b_mod = params["mod_b"].astype(jnp.float32).reshape(1, 2 * D)
    w_lin = params["lin_w"].astype(act_dtype)                 # (D, N)
    b_lin = params["lin_b"].astype(jnp.float32)               # (N,)

    # ---- adaLN modulation: silu once (exact, tiny), then weight-streamed matmul ----
    act = jax.nn.silu(c.astype(jnp.float32)).astype(act_dtype)

    two_d = 2 * D
    tn = _pick_col_tile(two_d)
    mod = pl.pallas_call(
        _mod_linear_kernel,
        grid=(two_d // tn,),
        in_specs=[
            pl.BlockSpec((B, D), lambda j: (0, 0)),
            pl.BlockSpec((D, tn), lambda j: (0, j)),
            pl.BlockSpec((1, tn), lambda j: (0, j)),
        ],
        out_specs=pl.BlockSpec((B, tn), lambda j: (0, j)),
        out_shape=jax.ShapeDtypeStruct((B, two_d), jnp.float32),
        compiler_params=pltpu.CompilerParams(
            dimension_semantics=("parallel",),
            vmem_limit_bytes=32 * 1024 * 1024),
    )(act, w_mod, b_mod)

    # chunk(2, dim=1) -> shift, scale; tiny (B, 1, D) f32 arrays read per-batch by
    # the fused kernel (no (B, S, D) broadcast).
    shift = mod[:, None, :D]
    scale = mod[:, None, D:]

    # ---- lane-dense output: pad N to the next multiple of 128 (no more) ----
    n_pad = ((N + 127) // 128) * 128
    if n_pad != N:
        w_lin = jnp.pad(w_lin, ((0, 0), (0, n_pad - N)))
        b_lin = jnp.pad(b_lin, (0, n_pad - N))
    b_lin2 = b_lin.reshape(1, n_pad)

    # ---- row tiling (divisor preferred; otherwise pad S to a tile multiple) ----
    tm, s_pad = _pick_row_tile(S)
    if s_pad != S:
        x = jnp.pad(x, ((0, 0), (0, s_pad - S), (0, 0)))

    # ---- fused LayerNorm + modulate + projection (HBM-bound on x) ----
    out = pl.pallas_call(
        functools.partial(_final_layer_kernel, eps=eps),
        grid=(B, s_pad // tm),
        in_specs=[
            pl.BlockSpec((1, tm, D), lambda b, i: (b, i, 0)),
            pl.BlockSpec((1, 1, D), lambda b, i: (b, 0, 0)),   # shift (per batch)
            pl.BlockSpec((1, 1, D), lambda b, i: (b, 0, 0)),   # scale (per batch)
            pl.BlockSpec((D, n_pad), lambda b, i: (0, 0)),     # W resident
            pl.BlockSpec((1, n_pad), lambda b, i: (0, 0)),     # bias resident
        ],
        out_specs=pl.BlockSpec((1, tm, n_pad), lambda b, i: (b, i, 0)),
        out_shape=jax.ShapeDtypeStruct((B, s_pad, n_pad), jnp.bfloat16),
        compiler_params=pltpu.CompilerParams(
            dimension_semantics=("parallel", "parallel"),      # megacore on v7x
            vmem_limit_bytes=48 * 1024 * 1024),                # fits v5e/v6e/v7x
    )(x, shift, scale, w_lin, b_lin2)

    if s_pad != S:
        out = out[:, :S]
    if keep_padded:
        return out
    return out[:, :, :N]


# ----------------------------------------------------------------------------
# Pure-JAX reference (float32) for correctness checking
# ----------------------------------------------------------------------------
def final_layer_ref(x, c, w_mod, b_mod, w_lin, b_lin, eps=1e-6):
    D = x.shape[-1]
    cs = jax.nn.silu(c)
    mod = cs @ w_mod + b_mod
    shift, scale = mod[:, :D], mod[:, D:]
    mu = jnp.mean(x, axis=-1, keepdims=True)
    var = jnp.mean((x - mu) ** 2, axis=-1, keepdims=True)
    xn = (x - mu) * lax.rsqrt(var + eps)
    xm = xn * (1.0 + scale[:, None, :]) + shift[:, None, :]
    return xm @ w_lin + b_lin


# ----------------------------------------------------------------------------
# Main
# ----------------------------------------------------------------------------
if __name__ == "__main__":
    key = jax.random.PRNGKey(0)
    k1, k2, k3, k4, k5, k6 = jax.random.split(key, 6)

    B, S, D = 2, 64, 128            # hidden_size = 128, 64 tokens (small test shapes)
    patch_size, out_channels = 2, 4
    N = patch_size * patch_size * out_channels
    std = 0.02

    x = jax.random.normal(k1, (B, S, D), jnp.float32).astype(jnp.bfloat16)
    c = jax.random.normal(k2, (B, D), jnp.float32).astype(jnp.bfloat16)

    params = dict(
        mod_w=(jax.random.normal(k3, (D, 2 * D), jnp.float32) * std).astype(jnp.bfloat16),
        mod_b=jax.random.normal(k4, (2 * D,), jnp.float32) * std,
        lin_w=(jax.random.normal(k5, (D, N), jnp.float32) * std).astype(jnp.bfloat16),
        lin_b=jax.random.normal(k6, (N,), jnp.float32) * std,
    )

    # keep_padded=True: the kernel's lane-dense (B, S, 128) output; the consumer
    # (here, the test) slices off the pad columns.
    out_padded = final_layer_forward(params, x, c,
                                     patch_size=patch_size,
                                     out_channels=out_channels,
                                     keep_padded=True)
    out_padded = jax.block_until_ready(out_padded)
    out = out_padded[:, :, :N]
    assert out.shape == (B, S, N), out.shape
    assert bool(jnp.all(jnp.isfinite(out)))

    ref = final_layer_ref(
        x.astype(jnp.float32), c.astype(jnp.float32),
        params["mod_w"].astype(jnp.float32), params["mod_b"].astype(jnp.float32),
        params["lin_w"].astype(jnp.float32), params["lin_b"].astype(jnp.float32))
    max_err = float(jnp.max(jnp.abs(out.astype(jnp.float32) - ref)))
    assert max_err < 5e-2, f"max abs err {max_err}"

    print("KERNEL_OK")
</pallas_src>

<mosaic_0001>
module attributes {stable_mosaic.version = 11 : i64} {
  func.func @_mod_linear_kernel(%arg0: i32, %arg1: memref<2x128xbf16, #tpu.memory_space<vmem>>, %arg2: memref<128x256xbf16, #tpu.memory_space<vmem>>, %arg3: memref<1x256xf32, #tpu.memory_space<vmem>>, %arg4: memref<2x256xf32, #tpu.memory_space<vmem>>) attributes {dimension_semantics = [#tpu.dimension_semantics<parallel>], iteration_bounds = array<i64: 1>, scalar_prefetch = 0 : i64, scratch_operands = 0 : i64, tpu.core_type = #tpu.core_type<tc>, window_params = [{pipeline_mode = #tpu.pipeline_mode<synchronous>, transform_indices = @transform_0, window_bounds = array<i64: 2, 128>}, {transform_indices = @transform_1, window_bounds = array<i64: 128, 256>}, {transform_indices = @transform_2, window_bounds = array<i64: 1, 256>}, {transform_indices = @transform_3, window_bounds = array<i64: 2, 256>}]} {
    %c0 = arith.constant 0 : index
    %c0_0 = arith.constant 0 : index
    %0 = vector.load %arg1[%c0, %c0_0] : memref<2x128xbf16, #tpu.memory_space<vmem>>, vector<2x128xbf16>
    %c0_1 = arith.constant 0 : index
    %c0_2 = arith.constant 0 : index
    %1 = vector.load %arg2[%c0_1, %c0_2] : memref<128x256xbf16, #tpu.memory_space<vmem>>, vector<128x256xbf16>
    %cst = arith.constant dense<0.000000e+00> : vector<2x256xf32>
    %2 = tpu.matmul %0, %1, %cst {dimension_numbers = #tpu.dot_dimension_numbers<[1], [0], [0], [1], [0, 0, 1, 1], [], []>} : vector<2x128xbf16>, vector<128x256xbf16>, vector<2x256xf32> -> vector<2x256xf32>
    %c0_3 = arith.constant 0 : index
    %c0_4 = arith.constant 0 : index
    %3 = vector.load %arg3[%c0_3, %c0_4] : memref<1x256xf32, #tpu.memory_space<vmem>>, vector<1x256xf32>
    %4 = vector.broadcast %3 : vector<1x256xf32> to vector<2x256xf32>
    %5 = arith.addf %2, %4 : vector<2x256xf32>
    %c0_5 = arith.constant 0 : index
    %c0_6 = arith.constant 0 : index
    %6 = vector.load %arg4[%c0_5, %c0_6] : memref<2x256xf32, #tpu.memory_space<vmem>>, vector<2x256xf32>
    tpu.vector_store %arg4[%c0_5, %c0_6], %5 {strides = array<i32>} : memref<2x256xf32, #tpu.memory_space<vmem>>, vector<2x256xf32>,
    return
  }
  func.func @transform_0(%arg0: i32) -> (i32, i32) {
    %c0_i32 = arith.constant 0 : i32
    %c0_i32_0 = arith.constant 0 : i32
    %c0_i32_1 = arith.constant 0 : i32
    return %c0_i32, %c0_i32_0 : i32, i32
  }
  func.func @transform_1(%arg0: i32) -> (i32, i32) {
    %c0_i32 = arith.constant 0 : i32
    %c0_i32_0 = arith.constant 0 : i32
    return %c0_i32, %arg0 : i32, i32
  }
  func.func @transform_2(%arg0: i32) -> (i32, i32) {
    %c0_i32 = arith.constant 0 : i32
    %c0_i32_0 = arith.constant 0 : i32
    return %c0_i32, %arg0 : i32, i32
  }
  func.func @transform_3(%arg0: i32) -> (i32, i32) {
    %c0_i32 = arith.constant 0 : i32
    %c0_i32_0 = arith.constant 0 : i32
    return %c0_i32, %arg0 : i32, i32
  }
}

</mosaic_0001>

<bundles_post_ra>
// kernel: tpu_custom_call.1
= control target key start
LH: loop header
LB: loop body
LE: loop exit
PB: predicated region body
PF: predicated region fallthrough
CT: control target
= control target key end

     0   :  { %8 = vsyncpa [#allocation3], 0  ;;  %s411_s0 = inlined_call_operand.hbm [shape: bf16[2,128], index: 0, kind: input, shape index: {}]   ;;  %s412_s1 = inlined_call_operand.hbm [shape: bf16[128,256], index: 1, kind: input, shape index: {}]   ;;  %s413_s2 = inlined_call_operand.vmem [shape: f32[1,256], index: 2, kind: input, shape index: {}]   ;;  %s414_s3 = inlined_call_operand.hbm [shape: f32[2,256], index: 3, kind: output, shape index: {}]  }
   0x1   :  { %9 = vsyncpa [#allocation6], 0 }
   0x2   :  { %10 = vsyncpa [#allocation4], 0  ;;  %s339_s12 = smov [#allocation2]   ;;  %s340_s14 = smov [#allocation5]  }
   0x3   :  { %s17_s13 = sshll.u32 %s339_s12, 4  ;;  %s26_s15 = sshll.u32 %s340_s14, 4  ;;  %s18_s13 = int_to_ptr.vmem [resolvable:$true] %s17_s13  ;;  %s365_s15 = int_to_ptr.vmem [resolvable:$true] %s26_s15 }
   0x4   :  { %s267_s18 = scalar_lea.hbm %s411_s0, 16 }
   0x5   :  { %p268_p0 = scmp.ne.s32.totalorder %s411_s0, %s267_s18  ;;  %p271_p1 = scmp.lt.u32.totalorder %s267_s18, %s411_s0 }
   0x7   :  { %p273_p2 = pnand %p271_p1, %p268_p0 }
   0x9   :  { %276 = shalt.err (!%p273_p2)
}
   0xa   :  { %s277_s23 = scalar_lea.vmem %s18_s13, 16  ;;  %s281_s24 = scalar_lea.vmem %s18_s13, 32 }
   0xb   :  { %p278_p3 = scmp.ne.s32.totalorder %s18_s13, %s277_s23  ;;  %p282_p4 = scmp.lt.s32.totalorder %s18_s13, %s18_s13 }
   0xc   :  { %p283_p5 = scmp.lt.s32.totalorder %s281_s24, %s277_s23 }
   0xe   :  { %p284_p6 = por %p283_p5, %p282_p4 }
  0x10   :  { %p285_p7 = pnand %p284_p6, %p278_p3 }
  0x12   :  { %288 = shalt.err (!%p285_p7)
}
  0x13   :  { %20 = dma.hbm_to_vmem [thread:$0]  %s411_s0, 16, %s18_s13, [#allocation3]  }
  0x14   :  { %s289_s29 = scalar_lea.hbm %s412_s1, 2048 }
  0x15   :  { %p290_p8 = scmp.ne.s32.totalorder %s412_s1, %s289_s29  ;;  %p293_p9 = scmp.lt.u32.totalorder %s289_s29, %s412_s1 }
  0x17   :  { %p295_p10 = pnand %p293_p9, %p290_p8 }
  0x19   :  { %298 = shalt.err (!%p295_p10)
}
  0x1a   :  { %s299_s7 = scalar_lea.vmem %s365_s15, 2048  ;;  %p304_p12 = scmp.lt.s32.totalorder %s365_s15, %s365_s15 }
  0x1b   :  { %p300_p11 = scmp.ne.s32.totalorder %s365_s15, %s299_s7  ;;  %p305_p13 = scmp.lt.s32.totalorder %s299_s7, %s299_s7 }
  0x1d   :  { %p306_p0 = por %p305_p13, %p304_p12 }
  0x1f   :  { %p307_p1 = pnand %p306_p0, %p300_p11 }
  0x21   :  { %310 = shalt.err (!%p307_p1)
}
  0x22   :  { %s341_s0 = smov 128   ;;  %s342_s8 = smov 8  }
  0x23   :  { %32 = dma.hbm_to_vmem [thread:$0]  %s412_s1, 2048, %s365_s15, [#allocation6], %s341_s0, %s341_s0, %s342_s8  }
  0x24   :  { %333 = dma.done.wait [#allocation3], 16  }
  0x25   :  { %334 = vsyncadd [#allocation3], 4294967280 }
  0x26   :  { %335 = dma.done.wait [#allocation6], 2048  }
  0x27   :  { %336 = vsyncadd [#allocation6], 4294965248  ;;  %v343_v0 = vmov 0   ;;  %v243_v1 = vld [vmem:[#allocation5 + $0x4] ss:$8 sps:$4 sm:$0xff]   ;;  %v61_v18 = vlaneseq  ;;  %s344_s12 = smov [#allocation7]  }
  0x28   :  { %183 = vmatprep.mubr.bf16.mxu0 %v343_v0  ;;  %v245_v2 = vld [vmem:[#allocation5] ss:$8 sps:$4 sm:$0xff]   ;;  %151 = vmatprep.subr.bf16.mxu0 %v243_v1  ;;  %v246_v3 = vld [vmem:[#allocation5 + $0x14] ss:$8 sps:$4 sm:$0xff]   ;;  %v248_v4 = vld [vmem:[#allocation5 + $0x10] ss:$8 sps:$4 sm:$0xff]  }
  0x29   :  { %152 = vmatpush1.bf16.msra.mxu0 %v245_v2  ;;  %v249_v5 = vld [vmem:[#allocation5 + $0x24] ss:$8 sps:$4 sm:$0xff]   ;;  %v251_v6 = vld [vmem:[#allocation5 + $0x20] ss:$8 sps:$4 sm:$0xff]   ;;  %v252_v7 = vld [vmem:[#allocation5 + $0x34] ss:$8 sps:$4 sm:$0xff]  }
  0x2a   :  { %153 = vmatprep.subr.bf16.mxu0 %v246_v3  ;;  %v254_v8 = vld [vmem:[#allocation5 + $0x30] ss:$8 sps:$4 sm:$0xff]   ;;  %v255_v9 = vld [vmem:[#allocation5 + $0x44] ss:$8 sps:$4 sm:$0xff]   ;;  %v257_v10 = vld [vmem:[#allocation5 + $0x40] ss:$8 sps:$4 sm:$0xff]  }
  0x2b   :  { %v258_v11 = vld [vmem:[#allocation5 + $0x54] ss:$8 sps:$4 sm:$0xff]   ;;  %v260_v12 = vld [vmem:[#allocation5 + $0x50] ss:$8 sps:$4 sm:$0xff]   ;;  %v261_v13 = vld [vmem:[#allocation5 + $0x64] ss:$8 sps:$4 sm:$0xff]  }
  0x2c   :  { %v263_v14 = vld [vmem:[#allocation5 + $0x60] ss:$8 sps:$4 sm:$0xff]   ;;  %v264_v15 = vld [vmem:[#allocation5 + $0x74] ss:$8 sps:$4 sm:$0xff]   ;;  %v266_v16 = vld [vmem:[#allocation5 + $0x70] ss:$8 sps:$4 sm:$0xff]  }
  0x2d   :  { %154 = vmatpush1.bf16.msra.mxu0 %v248_v4  ;;  %v42_v17 = vld [vmem:[#allocation2] sm:$0x1]  ;;  %v62_v19 = vshrl.u32 %v61_v18, 7  ;;  %v59_v21 = vld [vmem:[%s413_s2] sm:$0x3]  ;;  %s210_s13 = sshll.u32 %s344_s12, 4  ;;  %s211_s13 = int_to_ptr.vmem [resolvable:$true] %s210_s13 }
  0x2e   :  { %155 = vmatprep.subr.bf16.mxu0 %v249_v5  ;;  %s311_s14 = scalar_lea.vmem %s211_s13, 64  ;;  %p316_p3 = scmp.lt.s32.totalorder %s211_s13, %s211_s13 }
  0x2f   :  { %v63_v20 = vsub.s32 0, %v62_v19  ;;  %v67_v22 = vsub.s32 1, %v62_v19  ;;  %p312_p2 = scmp.ne.s32.totalorder %s211_s13, %s311_s14  ;;  %p317_p4 = scmp.lt.s32.totalorder %s311_s14, %s311_s14 }
  0x31   :  { %156 = vmatpush1.bf16.msra.mxu0 %v251_v6  ;;  %v64_v23 = vrot.slane %v59_v21, %v63_v20  ;;  %v68_v24 = vrot.slane %v59_v21, %v67_v22  ;;  %p318_p5 = por %p317_p4, %p316_p3 }
  0x32   :  { %157 = vmatprep.subr.bf16.mxu0 %v252_v7 }
  0x33   :  { %p319_p6 = pnand %p318_p5, %p312_p2 }
  0x35   :  { %158 = vmatpush1.bf16.msra.mxu0 %v254_v8 }
  0x36   :  { %159 = vmatprep.subr.bf16.mxu0 %v255_v9 }
  0x39   :  { %160 = vmatpush1.bf16.msra.mxu0 %v257_v10 }
  0x3a   :  { %161 = vmatprep.subr.bf16.mxu0 %v258_v11 }
  0x3d   :  { %162 = vmatpush1.bf16.msra.mxu0 %v260_v12 }
  0x3e   :  { %163 = vmatprep.subr.bf16.mxu0 %v261_v13 }
  0x41   :  { %164 = vmatpush1.bf16.msra.mxu0 %v263_v14 }
  0x42   :  { %165 = vmatprep.subr.bf16.mxu0 %v264_v15 }
  0x45   :  { %166 = vmatpush1.bf16.msra.mxu0 %v266_v16 }
  0x48   :  { %184 = vmatmul.mubr.bf16.vlgmr.msra.gmra.mrb[0].mxu0 %v42_v17 }
 0x11b   :  { %v185_v25 = vpop.f32.mrb[0].mxu0 }
 0x11c   :  { %v186_v26 = vadd.f32 %v185_v25, %v64_v23  ;;  %v187_v27 = vpop.f32.mrb[1].mxu0 }
 0x11d   :  { %v188_v28 = vadd.f32 %v187_v27, %v68_v24  ;;  %v189_v29 = vpop.f32.mrb[2].mxu0 }
 0x11e   :  { %v190_v30 = vpop.f32.mrb[3].mxu0 }
 0x11f   :  { %v194_v31 = vcombine.low %v186_v26, %v188_v28 }
 0x121   :  { %236 = vst.sshfl [vmem:[#allocation7] sm:$0x33 pattern:$0x76325410] %v194_v31 }
 0x122   :  { %322 = shalt.err (!%p319_p6)
}
 0x123   :  { %s323_s16 = scalar_lea.hbm %s414_s3, 64 }
 0x124   :  { %p324_p7 = scmp.ne.s32.totalorder %s414_s3, %s323_s16  ;;  %p327_p8 = scmp.lt.u32.totalorder %s323_s16, %s414_s3 }
 0x126   :  { %p329_p9 = pnand %p327_p8, %p324_p7 }
 0x128   :  { %332 = shalt.err (!%p329_p9)
}
 0x129   :  { %213 = dma.vmem_to_hbm [thread:$0]  %s211_s13, 64, %s414_s3, [#allocation4]  }
 0x12a   :  { %337 = dma.done.wait [#allocation4], 64  }
 0x12b   :  { %338 = vsyncadd [#allocation4], 4294967232 }
 0x12c   :  { %217 = vsyncpa [#allocation3], 1 }
 0x12d   :  { %218 = vsyncpa [#allocation6], 1 }
 0x12e   :  { %219 = vsyncpa [#allocation4], 1 }

</bundles_post_ra>
